<compile_context>
chip_gen: v7x
topology: tpu7x:2x2x1
jax: 0.10.0
libtpu: 0.0.40
codegen_flags: <defaults>
</compile_context>

<pallas_src>
import functools

import jax
import jax.numpy as jnp
from jax.experimental import pallas as pl
from jax.experimental.pallas import tpu as pltpu

_LANES = 128


def _sublane_multiple(dtype):
    bits = jnp.dtype(dtype).itemsize * 8
    return max(8, 256 // bits)   # 8 for 32-bit, 16 for bf16, 32 for 8-bit


def _device_kind():
    try:
        return jax.devices()[0].device_kind.lower()
    except Exception:
        return ""


def _bce_kernel(o_ref, t_ref, out_ref, *, block_rows, valid_rows,
                tiles_per_core, tiles_total, binary_targets):
    c = pl.program_id(0)   # parallel slice (one per TensorCore on v7x)
    i = pl.program_id(1)   # reduction step within the slice

    @pl.when(i == 0)
    def _():
        out_ref[...] = jnp.zeros_like(out_ref)

    o = o_ref[...].astype(jnp.float32)
    t = t_ref[...].astype(jnp.float32)

    if binary_targets:
        # Fast path for hard {0,1} targets: a single log per element.
        p = jnp.where(t > 0.5, o, 1.0 - o)
        loss = -jnp.maximum(jnp.log(p), -100.0)
    else:
        # PyTorch BCELoss clamps each log term at -100 for stability.
        log_o = jnp.maximum(jnp.log(o), -100.0)
        log_1mo = jnp.maximum(jnp.log(1.0 - o), -100.0)
        # Algebraic rewrite of -(t*log_o + (1-t)*log_1mo): saves a mul + sub.
        loss = -(log_1mo + t * (log_o - log_1mo))

    def fold(x):
        # Fold the block down to one (8, 128) vreg with element-wise VPU adds.
        return x.reshape(block_rows // 8, 8, _LANES).sum(axis=0)

    # UNclamped block index: the in_map clamps the DMA index so it never
    # starts past the array; this one is used for masking so a duplicated
    # overhang block (v7x 2-way split, odd tile count) contributes exactly 0.
    # Keep in sync with in_map() in bce_loss().
    block_idx = c * tiles_per_core + i

    @pl.when(block_idx < tiles_total - 1)
    def _():
        # Interior blocks are fully valid: unmasked accumulate (no iota/cmp/sel).
        out_ref[...] += fold(loss)

    @pl.when(block_idx >= tiles_total - 1)
    def _():
        # Last (possibly partial) block, or a duplicated clamped block on the
        # second parallel slice.  Must stay a select (jnp.where), NOT a
        # multiply-by-mask: garbage rows can hold NaN/Inf after the log.
        row0 = block_idx * block_rows
        rid = row0 + jax.lax.broadcasted_iota(jnp.int32, (block_rows, _LANES), 0)
        out_ref[...] += fold(jnp.where(rid < valid_rows, loss, 0.0))


def bce_loss(output, target, *, assume_binary_targets=False):
    """Mean binary cross-entropy over all elements (== nn.BCELoss())."""
    assert output.shape == target.shape
    n = output.size

    o = output.reshape(-1)
    t = target.reshape(-1)

    lane_pad = (-n) % _LANES
    if lane_pad:
        # Rare ragged case (numel not a multiple of 128): pad <128 elements
        # with (o=1, t=1), which contributes exactly 0 loss.  This costs one
        # extra HBM read+write of the inputs; the common aligned case above
        # is fully copy-free.
        # TODO(synk): handle the ragged tail with a manual-DMA tail pass so
        # this path is copy-free as well.
        o = jnp.pad(o, (0, lane_pad), constant_values=1)
        t = jnp.pad(t, (0, lane_pad), constant_values=1)

    rows = o.size // _LANES
    o2d = o.reshape(rows, _LANES)   # free (bitcast) reshape in the aligned case
    t2d = t.reshape(rows, _LANES)

    kind = _device_kind()
    is_v7x = "v7" in kind
    num_parallel = 2 if is_v7x else 1          # megacore split only on v7x
    target_rows = 8192 if is_v7x else 4096     # 4 MiB / 2 MiB per f32 buffer

    sub = max(_sublane_multiple(o2d.dtype), _sublane_multiple(t2d.dtype))
    rows_rounded = ((rows + sub - 1) // sub) * sub
    block_rows = min(target_rows, rows_rounded)

    tiles_total = pl.cdiv(rows, block_rows)
    tiles_per_core = pl.cdiv(tiles_total, num_parallel)

    kernel = functools.partial(
        _bce_kernel,
        block_rows=block_rows,
        valid_rows=rows,
        tiles_per_core=tiles_per_core,
        tiles_total=tiles_total,
        binary_targets=assume_binary_targets,
    )

    def in_map(c, i):
        # CLAMPED so the DMA never starts past the array end; the kernel
        # masks with the UNclamped index so a duplicated block adds 0.
        # Keep in sync with block_idx in _bce_kernel().
        return (jnp.minimum(c * tiles_per_core + i, tiles_total - 1), 0)

    partials = pl.pallas_call(
        kernel,
        out_shape=jax.ShapeDtypeStruct((num_parallel * 8, _LANES), jnp.float32),
        grid_spec=pltpu.PrefetchScalarGridSpec(
            num_scalar_prefetch=0,
            grid=(num_parallel, tiles_per_core),
            in_specs=[
                pl.BlockSpec((block_rows, _LANES), in_map),
                pl.BlockSpec((block_rows, _LANES), in_map),
            ],
            # The output block IS the accumulator: resident across the
            # "arbitrary" axis, written back once per parallel slice.
            out_specs=pl.BlockSpec((8, _LANES), lambda c, i: (c, 0)),
        ),
        compiler_params=pltpu.CompilerParams(
            dimension_semantics=("parallel", "arbitrary"),
            vmem_limit_bytes=32 * 1024 * 1024,
        ),
    )(o2d, t2d)

    # Tiny final cross-lane reduce + mean in the wrapper (<= 2048 f32 values).
    return jnp.sum(partials) / jnp.float32(n)


def _bce_reference(output, target):
    o = output.astype(jnp.float32)
    t = target.astype(jnp.float32)
    log_o = jnp.maximum(jnp.log(o), -100.0)
    log_1mo = jnp.maximum(jnp.log(1.0 - o), -100.0)
    return jnp.mean(-(t * log_o + (1.0 - t) * log_1mo))


if __name__ == "__main__":
    key = jax.random.PRNGKey(0)
    k1, k2, k3, k4 = jax.random.split(key, 4)

    # Small shapes consistent with a segmentation-style output/target.
    shape = (2, 4, 16, 16)
    output = jax.nn.sigmoid(jax.random.normal(k1, shape, jnp.float32))
    target = (jax.random.uniform(k2, shape) > 0.5).astype(jnp.float32)

    loss = bce_loss(output, target)
    jax.block_until_ready(loss)
    ref = _bce_reference(output, target)
    assert jnp.allclose(loss, ref, rtol=1e-5, atol=1e-6), (loss, ref)

    # Opt-in binary-target fast path (single log) matches for hard {0,1} labels.
    loss_fast = bce_loss(output, target, assume_binary_targets=True)
    jax.block_until_ready(loss_fast)
    assert jnp.allclose(loss_fast, ref, rtol=1e-5, atol=1e-6), (loss_fast, ref)

    # Ragged case (numel % 128 != 0, soft targets) exercises the fallback path.
    shape2 = (3, 5, 7)
    out2 = jax.nn.sigmoid(jax.random.normal(k3, shape2, jnp.float32))
    tgt2 = jax.random.uniform(k4, shape2)
    loss2 = bce_loss(out2, tgt2)
    jax.block_until_ready(loss2)
    ref2 = _bce_reference(out2, tgt2)
    assert jnp.allclose(loss2, ref2, rtol=1e-5, atol=1e-6), (loss2, ref2)

    print("KERNEL_OK")
</pallas_src>

<mosaic_0001>
module attributes {stable_mosaic.version = 11 : i64} {
  func.func @_bce_kernel(%arg0: i32, %arg1: i32, %arg2: memref<16x128xf32, #tpu.memory_space<vmem>>, %arg3: memref<16x128xf32, #tpu.memory_space<vmem>>, %arg4: memref<8x128xf32, #tpu.memory_space<vmem>>) attributes {dimension_semantics = [#tpu.dimension_semantics<parallel>, #tpu.dimension_semantics<arbitrary>], iteration_bounds = array<i64: 1, 1>, scalar_prefetch = 0 : i64, scratch_operands = 0 : i64, tpu.core_type = #tpu.core_type<tc>, window_params = [{transform_indices = @transform_0, window_bounds = array<i64: 16, 128>}, {transform_indices = @transform_1, window_bounds = array<i64: 16, 128>}, {transform_indices = @transform_2, window_bounds = array<i64: 8, 128>}]} {
    %c0_i32 = arith.constant 0 : i32
    %0 = arith.cmpi eq, %arg1, %c0_i32 : i32
    %1 = arith.extui %0 : i1 to i32
    %c0_i32_0 = arith.constant 0 : i32
    %2 = arith.cmpi ne, %1, %c0_i32_0 : i32
    scf.if %2 {
      %cst_11 = arith.constant 0.000000e+00 : f32
      %26 = vector.broadcast %cst_11 : f32 to vector<8x128xf32>
      %c0_12 = arith.constant 0 : index
      %c0_13 = arith.constant 0 : index
      %27 = vector.load %arg4[%c0_12, %c0_13] : memref<8x128xf32, #tpu.memory_space<vmem>>, vector<8x128xf32>
      tpu.vector_store %arg4[%c0_12, %c0_13], %26 {strides = array<i32>} : memref<8x128xf32, #tpu.memory_space<vmem>>, vector<8x128xf32>,
    } else {
    }
    %c0 = arith.constant 0 : index
    %c0_1 = arith.constant 0 : index
    %3 = vector.load %arg2[%c0, %c0_1] : memref<16x128xf32, #tpu.memory_space<vmem>>, vector<16x128xf32>
    %c0_2 = arith.constant 0 : index
    %c0_3 = arith.constant 0 : index
    %4 = vector.load %arg3[%c0_2, %c0_3] : memref<16x128xf32, #tpu.memory_space<vmem>>, vector<16x128xf32>
    %5 = math.log %3 : vector<16x128xf32>
    %cst = arith.constant -1.000000e+02 : f32
    %6 = vector.broadcast %cst : f32 to vector<16x128xf32>
    %7 = arith.maximumf %5, %6 : vector<16x128xf32>
    %cst_4 = arith.constant 1.000000e+00 : f32
    %8 = vector.broadcast %cst_4 : f32 to vector<16x128xf32>
    %9 = arith.subf %8, %3 : vector<16x128xf32>
    %10 = math.log %9 : vector<16x128xf32>
    %cst_5 = arith.constant -1.000000e+02 : f32
    %11 = vector.broadcast %cst_5 : f32 to vector<16x128xf32>
    %12 = arith.maximumf %10, %11 : vector<16x128xf32>
    %13 = arith.subf %7, %12 : vector<16x128xf32>
    %14 = arith.mulf %4, %13 : vector<16x128xf32>
    %15 = arith.addf %12, %14 : vector<16x128xf32>
    %cst_6 = arith.constant 0.000000e+00 : f32
    %16 = vector.broadcast %cst_6 : f32 to vector<16x128xf32>
    %17 = arith.subf %16, %15 : vector<16x128xf32>
    %c1_i32 = arith.constant 1 : i32
    %18 = arith.muli %arg0, %c1_i32 : i32
    %19 = arith.addi %18, %arg1 : i32
    %c0_i32_7 = arith.constant 0 : i32
    %20 = arith.cmpi slt, %19, %c0_i32_7 : i32
    %21 = arith.extui %20 : i1 to i32
    %c0_i32_8 = arith.constant 0 : i32
    %22 = arith.cmpi ne, %21, %c0_i32_8 : i32
    scf.if %22 {
      %c0_11 = arith.constant 0 : index
      %c0_12 = arith.constant 0 : index
      %26 = vector.load %arg4[%c0_11, %c0_12] : memref<8x128xf32, #tpu.memory_space<vmem>>, vector<8x128xf32>
      %27 = vector.shape_cast %17 : vector<16x128xf32> to vector<2x8x128xf32>
      %cst_13 = arith.constant dense<0.000000e+00> : vector<8x128xf32>
      %28 = vector.multi_reduction <add>, %27, %cst_13 [0] : vector<2x8x128xf32> to vector<8x128xf32>
      %29 = arith.addf %26, %28 : vector<8x128xf32>
      %c0_14 = arith.constant 0 : index
      %c0_15 = arith.constant 0 : index
      %30 = vector.load %arg4[%c0_14, %c0_15] : memref<8x128xf32, #tpu.memory_space<vmem>>, vector<8x128xf32>
      tpu.vector_store %arg4[%c0_14, %c0_15], %29 {strides = array<i32>} : memref<8x128xf32, #tpu.memory_space<vmem>>, vector<8x128xf32>,
    } else {
    }
    %c0_i32_9 = arith.constant 0 : i32
    %23 = arith.cmpi sge, %19, %c0_i32_9 : i32
    %24 = arith.extui %23 : i1 to i32
    %c0_i32_10 = arith.constant 0 : i32
    %25 = arith.cmpi ne, %24, %c0_i32_10 : i32
    scf.if %25 {
      %c16_i32 = arith.constant 16 : i32
      %26 = arith.muli %19, %c16_i32 : i32
      %27 = tpu.iota {dimensions = array<i32: 0>} : vector<16x128xi32>
      %28 = vector.broadcast %26 : i32 to vector<16x128xi32>
      %29 = arith.addi %28, %27 : vector<16x128xi32>
      %c0_11 = arith.constant 0 : index
      %c0_12 = arith.constant 0 : index
      %30 = vector.load %arg4[%c0_11, %c0_12] : memref<8x128xf32, #tpu.memory_space<vmem>>, vector<8x128xf32>
      %c16_i32_13 = arith.constant 16 : i32
      %31 = vector.broadcast %c16_i32_13 : i32 to vector<16x128xi32>
      %32 = arith.cmpi slt, %29, %31 : vector<16x128xi32>
      %cst_14 = arith.constant 0.000000e+00 : f32
      %33 = vector.broadcast %cst_14 : f32 to vector<16x128xf32>
      %34 = arith.select %32, %17, %33 : vector<16x128xi1>, vector<16x128xf32>
      %35 = vector.shape_cast %34 : vector<16x128xf32> to vector<2x8x128xf32>
      %cst_15 = arith.constant dense<0.000000e+00> : vector<8x128xf32>
      %36 = vector.multi_reduction <add>, %35, %cst_15 [0] : vector<2x8x128xf32> to vector<8x128xf32>
      %37 = arith.addf %30, %36 : vector<8x128xf32>
      %c0_16 = arith.constant 0 : index
      %c0_17 = arith.constant 0 : index
      %38 = vector.load %arg4[%c0_16, %c0_17] : memref<8x128xf32, #tpu.memory_space<vmem>>, vector<8x128xf32>
      tpu.vector_store %arg4[%c0_16, %c0_17], %37 {strides = array<i32>} : memref<8x128xf32, #tpu.memory_space<vmem>>, vector<8x128xf32>,
    } else {
    }
    return
  }
  func.func @transform_0(%arg0: i32, %arg1: i32) -> (i32, i32) {
    %c1_i32 = arith.constant 1 : i32
    %0 = arith.muli %arg0, %c1_i32 : i32
    %1 = arith.addi %0, %arg1 : i32
    %c0_i32 = arith.constant 0 : i32
    %2 = arith.minsi %1, %c0_i32 : i32
    %c0_i32_0 = arith.constant 0 : i32
    %c0_i32_1 = arith.constant 0 : i32
    return %2, %c0_i32_0 : i32, i32
  }
  func.func @transform_1(%arg0: i32, %arg1: i32) -> (i32, i32) {
    %c1_i32 = arith.constant 1 : i32
    %0 = arith.muli %arg0, %c1_i32 : i32
    %1 = arith.addi %0, %arg1 : i32
    %c0_i32 = arith.constant 0 : i32
    %2 = arith.minsi %1, %c0_i32 : i32
    %c0_i32_0 = arith.constant 0 : i32
    %c0_i32_1 = arith.constant 0 : i32
    return %2, %c0_i32_0 : i32, i32
  }
  func.func @transform_2(%arg0: i32, %arg1: i32) -> (i32, i32) {
    %c0_i32 = arith.constant 0 : i32
    %c0_i32_0 = arith.constant 0 : i32
    return %arg0, %c0_i32 : i32, i32
  }
}

</mosaic_0001>

<bundles_post_ra>
// kernel: tpu_custom_call.1
= control target key start
LH: loop header
LB: loop body
LE: loop exit
PB: predicated region body
PF: predicated region fallthrough
CT: control target
= control target key end

     0   :  { %7 = vsyncpa [#allocation3], 0  ;;  %s281_s0 = inlined_call_operand.hbm [shape: f32[16,128], index: 0, kind: input, shape index: {}]   ;;  %s282_s1 = inlined_call_operand.hbm [shape: f32[16,128], index: 1, kind: input, shape index: {}]   ;;  %s283_s2 = inlined_call_operand.hbm [shape: f32[8,128], index: 2, kind: output, shape index: {}]  }
   0x1   :  { %8 = vsyncpa [#allocation6], 0 }
   0x2   :  { %9 = vsyncpa [#allocation4], 0  ;;  %s225_s9 = smov [#allocation2]   ;;  %s153_s13 = scalar_lea.hbm %s281_s0, 256 }
   0x3   :  { %s21_s10 = sshll.u32 %s225_s9, 4  ;;  %p154_p0 = scmp.ne.s32.totalorder %s281_s0, %s153_s13  ;;  %s22_s10 = int_to_ptr.vmem [resolvable:$true] %s21_s10 }
   0x4   :  { %p157_p1 = scmp.lt.u32.totalorder %s153_s13, %s281_s0 }
   0x6   :  { %p159_p2 = pnand %p157_p1, %p154_p0 }
   0x8   :  { %162 = shalt.err (!%p159_p2)
}
   0x9   :  { %s163_s18 = scalar_lea.vmem %s22_s10, 256  ;;  %p168_p4 = scmp.lt.s32.totalorder %s22_s10, %s22_s10 }
   0xa   :  { %p164_p3 = scmp.ne.s32.totalorder %s22_s10, %s163_s18  ;;  %p169_p5 = scmp.lt.s32.totalorder %s163_s18, %s163_s18 }
   0xc   :  { %p170_p6 = por %p169_p5, %p168_p4 }
   0xe   :  { %p171_p7 = pnand %p170_p6, %p164_p3 }
  0x10   :  { %174 = shalt.err (!%p171_p7)
}
  0x11   :  { %s226_s19 = smov 128   ;;  %s227_s20 = smov 8  }
  0x12   :  { %27 = dma.hbm_to_vmem [thread:$0]  %s281_s0, 256, %s22_s10, [#allocation3], %s226_s19, %s226_s19, %s227_s20  }
  0x13   :  { %s228_s23 = smov [#allocation5]   ;;  %s175_s27 = scalar_lea.hbm %s282_s1, 256 }
  0x14   :  { %s39_s24 = sshll.u32 %s228_s23, 4  ;;  %p176_p8 = scmp.ne.s32.totalorder %s282_s1, %s175_s27  ;;  %s40_s24 = int_to_ptr.vmem [resolvable:$true] %s39_s24 }
  0x15   :  { %p179_p9 = scmp.lt.u32.totalorder %s175_s27, %s282_s1 }
  0x17   :  { %p181_p10 = pnand %p179_p9, %p176_p8 }
  0x19   :  { %184 = shalt.err (!%p181_p10)
}
  0x1a   :  { %s185_s4 = scalar_lea.vmem %s40_s24, 256  ;;  %p190_p12 = scmp.lt.s32.totalorder %s40_s24, %s40_s24 }
  0x1b   :  { %p186_p11 = scmp.ne.s32.totalorder %s40_s24, %s185_s4  ;;  %p191_p13 = scmp.lt.s32.totalorder %s185_s4, %s185_s4 }
  0x1d   :  { %p192_p0 = por %p191_p13, %p190_p12 }
  0x1f   :  { %p193_p1 = pnand %p192_p0, %p186_p11 }
  0x21   :  { %196 = shalt.err (!%p193_p1)
}
  0x22   :  { %45 = dma.hbm_to_vmem [thread:$0]  %s282_s1, 256, %s40_s24, [#allocation6], %s226_s19, %s226_s19, %s227_s20  }
  0x23   :  { %219 = dma.done.wait [#allocation3], 256  }
  0x24   :  { %220 = vsyncadd [#allocation3], 4294967040 }
  0x25   :  { %221 = dma.done.wait [#allocation6], 256  }
  0x26   :  { %222 = vsyncadd [#allocation6], 4294967040  ;;  %v65_v0 = vld [vmem:[#allocation2] sm:$0xff]  ;;  %v66_v1 = vld [vmem:[#allocation2 + $0x8] sm:$0xff]  ;;  %s229_s1 = smov [#allocation7]  }
  0x27   :  { %145 = vlog2.f32 %v65_v0  ;;  %v75_v2 = vsub.f32 1.0, %v65_v0  ;;  %v76_v3 = vsub.f32 1.0, %v66_v1  ;;  %v67_v15 = vld [vmem:[#allocation5] sm:$0xff]  ;;  %v68_v17 = vld [vmem:[#allocation5 + $0x8] sm:$0xff]  ;;  %s125_s6 = sshll.u32 %s229_s1, 4  ;;  %s126_s6 = int_to_ptr.vmem [resolvable:$true] %s125_s6 }
  0x28   :  { %147 = vlog2.f32 %v66_v1  ;;  %s197_s7 = scalar_lea.vmem %s126_s6, 128  ;;  %p202_p3 = scmp.lt.s32.totalorder %s126_s6, %s126_s6 }
  0x29   :  { %149 = vlog2.f32 %v75_v2  ;;  %p198_p2 = scmp.ne.s32.totalorder %s126_s6, %s197_s7  ;;  %p203_p4 = scmp.lt.s32.totalorder %s197_s7, %s197_s7 }
  0x2a   :  { %151 = vlog2.f32 %v76_v3 }
  0x2b   :  { %p204_p5 = por %p203_p4, %p202_p3 }
  0x2d   :  { %p205_p6 = pnand %p204_p5, %p198_p2 }
  0x31   :  { %v146_v4 = vpop.eup %145 }
  0x32   :  { %v148_v5 = vpop.eup %147  ;;  %v70_v6 = vmul.f32 0.6931472, %v146_v4 }
  0x33   :  { %v150_v7 = vpop.eup %149  ;;  %v72_v8 = vmul.f32 0.6931472, %v148_v5 }
  0x34   :  { %v152_v9 = vpop.eup %151  ;;  %v73_v10 = vmax.f32 %v70_v6, -100.0  ;;  %v78_v11 = vmul.f32 0.6931472, %v150_v7 }
  0x35   :  { %v74_v12 = vmax.f32 %v72_v8, -100.0  ;;  %v80_v13 = vmul.f32 0.6931472, %v152_v9 }
  0x36   :  { %v81_v14 = vmax.f32 %v78_v11, -100.0 }
  0x37   :  { %v82_v16 = vmax.f32 %v80_v13, -100.0 }
  0x38   :  { %v83_v18 = vsub.f32 %v73_v10, %v81_v14 }
  0x39   :  { %v84_v19 = vsub.f32 %v74_v12, %v82_v16 }
  0x3a   :  { %v85_v20 = vmul.f32 %v83_v18, %v67_v15 }
  0x3b   :  { %v86_v21 = vmul.f32 %v84_v19, %v68_v17 }
  0x3c   :  { %v87_v22 = vadd.f32 %v85_v20, %v81_v14 }
  0x3d   :  { %v88_v23 = vadd.f32 %v86_v21, %v82_v16 }
  0x3e   :  { %v89_v24 = vsub.f32 0.0, %v87_v22 }
  0x3f   :  { %v90_v25 = vsub.f32 0.0, %v88_v23 }
  0x41   :  { %v116_v26 = vadd.f32 %v90_v25, %v89_v24 }
  0x43   :  { %118 = vst [vmem:[#allocation7] sm:$0xff] %v116_v26 }
  0x44   :  { %208 = shalt.err (!%p205_p6)
}
  0x45   :  { %s209_s10 = scalar_lea.hbm %s283_s2, 128 }
  0x46   :  { %p210_p7 = scmp.ne.s32.totalorder %s283_s2, %s209_s10  ;;  %p213_p8 = scmp.lt.u32.totalorder %s209_s10, %s283_s2 }
  0x48   :  { %p215_p9 = pnand %p213_p8, %p210_p7 }
  0x4a   :  { %218 = shalt.err (!%p215_p9)
}
  0x4b   :  { %128 = dma.vmem_to_hbm [thread:$0]  %s126_s6, 128, %s283_s2, [#allocation4]  }
  0x4c   :  { %223 = dma.done.wait [#allocation4], 128  }
  0x4d   :  { %224 = vsyncadd [#allocation4], 4294967168 }
  0x4e   :  { %132 = vsyncpa [#allocation3], 1 }
  0x4f   :  { %133 = vsyncpa [#allocation6], 1 }
  0x50   :  { %134 = vsyncpa [#allocation4], 1 }

</bundles_post_ra>
